<compile_context>
chip_gen: v6e
topology: v6e:2x2x1
jax: 0.10.0
libtpu: 0.0.40
codegen_flags: <defaults>
</compile_context>

<pallas_src>
import jax
import jax.numpy as jnp
from jax.experimental import pallas as pl
from jax.experimental.pallas import tpu as pltpu


def _linear2x2_kernel(w_ref, b_ref, x_ref, o_ref):
    """VPU-only 2->2 linear on interleaved lanes.

    w_ref : SMEM (4,)  row-major [w00, w01, w10, w11]
    b_ref : SMEM (2,)  [b0, b1]
    x_ref : VMEM (block_rows, 128)  even lanes = feature 0, odd = feature 1
    o_ref : VMEM (block_rows, 128)  same interleaved layout
    """
    # f32 compute path (v5e VALU has no bf16).  On v6e/v7x a bf16 activation
    # could stay bf16 end-to-end to halve HBM bytes.
    x = x_ref[...].astype(jnp.float32)
    nl = x.shape[-1]                                   # 128 lanes

    # Pairs (2i, 2i+1) never straddle a row (128 is even), so the rotation
    # wraparound only lands on lanes whose parity discards that value.
    x_right = pltpu.roll(x, shift=nl - 1, axis=1)      # result[i] = x[i+1]
    x_left = pltpu.roll(x, shift=1, axis=1)            # result[i] = x[i-1]

    lane = jax.lax.broadcasted_iota(jnp.int32, x.shape, dimension=1)
    is_even = (lane & 1) == 0

    even_out = x * w_ref[0] + x_right * w_ref[1] + b_ref[0]   # out feature 0
    odd_out = x_left * w_ref[2] + x * w_ref[3] + b_ref[1]     # out feature 1

    # Single full-block, unmasked store.
    o_ref[...] = jnp.where(is_even, even_out, odd_out).astype(o_ref.dtype)


def linear_pallas(x, weight, bias, *, block_rows=2048):
    """out = x @ weight.T + bias  (PyTorch nn.Linear(2, 2) semantics)."""
    B, in_f = x.shape
    out_f, in_f_w = weight.shape
    assert in_f == in_f_w == 2 and out_f == 2, "kernel specialised to Linear(2, 2)"

    n = B * in_f                          # interleaved flat length
    rows = pl.cdiv(n, 128)                # lane-dense rows needed

    # Block rows: multiple of 8 (sublane-dense), capped so large inputs give
    # >= 4 grid steps ("parallel" axis can then shard across v7x's two TCs).
    br = max(8, min(block_rows, pl.cdiv(rows, 4)))
    br = pl.cdiv(br, 8) * 8
    rows_pad = pl.cdiv(rows, br) * br
    grid = (rows_pad // br,)

    # Free reshape of the contiguous (B, 2) buffer; only the tail is padded.
    flat = x.reshape(-1)
    total = rows_pad * 128
    if total != n:
        flat = jnp.pad(flat, (0, total - n))
    x2d = flat.reshape(rows_pad, 128)

    w_flat = weight.reshape(-1).astype(jnp.float32)   # (4,)  -> SMEM
    b_flat = bias.astype(jnp.float32)                 # (2,)  -> SMEM

    out2d = pl.pallas_call(
        _linear2x2_kernel,
        out_shape=jax.ShapeDtypeStruct((rows_pad, 128), x.dtype),
        grid=grid,
        in_specs=[
            pl.BlockSpec(memory_space=pltpu.SMEM),           # weight (whole)
            pl.BlockSpec(memory_space=pltpu.SMEM),           # bias   (whole)
            pl.BlockSpec((br, 128), lambda i: (i, 0)),       # activation tile
        ],
        out_specs=pl.BlockSpec((br, 128), lambda i: (i, 0)),
        compiler_params=pltpu.CompilerParams(
            dimension_semantics=("parallel",),
            vmem_limit_bytes=32 * 1024 * 1024),
    )(w_flat, b_flat, x2d)

    # Output keeps the input's interleaved layout (out_f == in_f == 2): a free
    # reshape + tail slice recovers (B, out_f).  Padded lanes hold only the
    # bias value and are discarded here.
    return out2d.reshape(-1)[:n].reshape(B, out_f)


if __name__ == "__main__":
    key = jax.random.PRNGKey(0)
    kx, kw, kb = jax.random.split(key, 3)

    # Same shapes as nn.Linear(2, 2) with torch-style U(-1/sqrt(in), 1/sqrt(in)).
    in_features, out_features = 2, 2
    bound = 1.0 / jnp.sqrt(jnp.float32(in_features))
    weight = jax.random.uniform(
        kw, (out_features, in_features), jnp.float32, -bound, bound)
    bias = jax.random.uniform(kb, (out_features,), jnp.float32, -bound, bound)

    # Small input consistent with the forward: (batch=8, features=2).
    x = jax.random.normal(kx, (8, in_features), dtype=jnp.float32)

    out = linear_pallas(x, weight, bias)
    out = jax.block_until_ready(out)

    # Cross-check against plain JAX reference.
    ref = x @ weight.T + bias
    assert out.shape == (8, out_features)
    assert jnp.allclose(out, ref, atol=1e-5, rtol=1e-5)

    print("KERNEL_OK")
</pallas_src>

<mosaic_0001>
module attributes {stable_mosaic.version = 11 : i64} {
  func.func @_linear2x2_kernel(%arg0: i32, %arg1: memref<4xf32, #tpu.memory_space<smem>>, %arg2: memref<2xf32, #tpu.memory_space<smem>>, %arg3: memref<8x128xf32, #tpu.memory_space<vmem>>, %arg4: memref<8x128xf32, #tpu.memory_space<vmem>>) attributes {dimension_semantics = [#tpu.dimension_semantics<parallel>], iteration_bounds = array<i64: 1>, scalar_prefetch = 0 : i64, scratch_operands = 0 : i64, tpu.core_type = #tpu.core_type<tc>, window_params = [{transform_indices = @transform_0, window_bounds = array<i64: 4>}, {transform_indices = @transform_1, window_bounds = array<i64: 2>}, {transform_indices = @transform_2, window_bounds = array<i64: 8, 128>}, {transform_indices = @transform_3, window_bounds = array<i64: 8, 128>}]} {
    %c0 = arith.constant 0 : index
    %c0_0 = arith.constant 0 : index
    %0 = vector.load %arg3[%c0, %c0_0] : memref<8x128xf32, #tpu.memory_space<vmem>>, vector<8x128xf32>
    %c127_i32 = arith.constant 127 : i32
    %1 = tpu.dynamic_rotate %0 by %c127_i32 dim 1 : vector<8x128xf32>, i32 -> vector<8x128xf32>
    %c1_i32 = arith.constant 1 : i32
    %2 = tpu.dynamic_rotate %0 by %c1_i32 dim 1 : vector<8x128xf32>, i32 -> vector<8x128xf32>
    %3 = tpu.iota {dimensions = array<i32: 1>} : vector<8x128xi32>
    %c1_i32_1 = arith.constant 1 : i32
    %4 = vector.broadcast %c1_i32_1 : i32 to vector<8x128xi32>
    %5 = arith.andi %3, %4 : vector<8x128xi32>
    %c0_i32 = arith.constant 0 : i32
    %6 = vector.broadcast %c0_i32 : i32 to vector<8x128xi32>
    %7 = arith.cmpi eq, %5, %6 : vector<8x128xi32>
    %c0_2 = arith.constant 0 : index
    %8 = memref.load %arg1[%c0_2] : memref<4xf32, #tpu.memory_space<smem>>
    %9 = vector.broadcast %8 : f32 to vector<8x128xf32>
    %10 = arith.mulf %0, %9 : vector<8x128xf32>
    %c1 = arith.constant 1 : index
    %11 = memref.load %arg1[%c1] : memref<4xf32, #tpu.memory_space<smem>>
    %12 = vector.broadcast %11 : f32 to vector<8x128xf32>
    %13 = arith.mulf %1, %12 : vector<8x128xf32>
    %14 = arith.addf %10, %13 : vector<8x128xf32>
    %c0_3 = arith.constant 0 : index
    %15 = memref.load %arg2[%c0_3] : memref<2xf32, #tpu.memory_space<smem>>
    %16 = vector.broadcast %15 : f32 to vector<8x128xf32>
    %17 = arith.addf %14, %16 : vector<8x128xf32>
    %c2 = arith.constant 2 : index
    %18 = memref.load %arg1[%c2] : memref<4xf32, #tpu.memory_space<smem>>
    %19 = vector.broadcast %18 : f32 to vector<8x128xf32>
    %20 = arith.mulf %2, %19 : vector<8x128xf32>
    %c3 = arith.constant 3 : index
    %21 = memref.load %arg1[%c3] : memref<4xf32, #tpu.memory_space<smem>>
    %22 = vector.broadcast %21 : f32 to vector<8x128xf32>
    %23 = arith.mulf %0, %22 : vector<8x128xf32>
    %24 = arith.addf %20, %23 : vector<8x128xf32>
    %c1_4 = arith.constant 1 : index
    %25 = memref.load %arg2[%c1_4] : memref<2xf32, #tpu.memory_space<smem>>
    %26 = vector.broadcast %25 : f32 to vector<8x128xf32>
    %27 = arith.addf %24, %26 : vector<8x128xf32>
    %28 = arith.select %7, %17, %27 : vector<8x128xi1>, vector<8x128xf32>
    %c0_5 = arith.constant 0 : index
    %c0_6 = arith.constant 0 : index
    %29 = vector.load %arg4[%c0_5, %c0_6] : memref<8x128xf32, #tpu.memory_space<vmem>>, vector<8x128xf32>
    tpu.vector_store %arg4[%c0_5, %c0_6], %28 {strides = array<i32>} : memref<8x128xf32, #tpu.memory_space<vmem>>, vector<8x128xf32>,
    return
  }
  func.func @transform_0(%arg0: i32) -> i32 {
    %c0_i32 = arith.constant 0 : i32
    %c0_i32_0 = arith.constant 0 : i32
    return %c0_i32 : i32
  }
  func.func @transform_1(%arg0: i32) -> i32 {
    %c0_i32 = arith.constant 0 : i32
    %c0_i32_0 = arith.constant 0 : i32
    return %c0_i32 : i32
  }
  func.func @transform_2(%arg0: i32) -> (i32, i32) {
    %c0_i32 = arith.constant 0 : i32
    %c0_i32_0 = arith.constant 0 : i32
    return %arg0, %c0_i32 : i32, i32
  }
  func.func @transform_3(%arg0: i32) -> (i32, i32) {
    %c0_i32 = arith.constant 0 : i32
    %c0_i32_0 = arith.constant 0 : i32
    return %arg0, %c0_i32 : i32, i32
  }
}

</mosaic_0001>

<bundles_post_ra>
// kernel: tpu_custom_call.1
= control target key start
LH: loop header
LB: loop body
LE: loop exit
PB: predicated region body
PF: predicated region fallthrough
CT: control target
= control target key end

     0   :  { %8 = vsyncpa [#allocation5], 0  ;;  %s214_s0 = inlined_call_operand.hbm [shape: f32[4], index: 0, kind: input, shape index: {}]   ;;  %s215_s1 = inlined_call_operand.vmem [shape: f32[2], index: 1, kind: input, shape index: {}]   ;;  %s216_s2 = inlined_call_operand.hbm [shape: f32[8,128], index: 2, kind: input, shape index: {}]   ;;  %s217_s3 = inlined_call_operand.hbm [shape: f32[8,128], index: 3, kind: output, shape index: {}]  }
   0x1   :  { %9 = vsyncpa [#allocation6], 0 }
   0x2   :  { %10 = vsyncpa [#allocation3], 0 }
   0x3   :  { %11 = vsyncpa [#allocation4], 0  ;;  %s26_s14 = sshll.u32 %s215_s1, 4  ;;  %s176_s15 = smov [#allocation2]   ;;  %s27_s14 = int_to_ptr.vmem [resolvable:$true] %s26_s14 }
   0x4   :  { %19 = dma.hbm_to_smem %s214_s0, 16, %s176_s15, [#allocation5]  }
   0x5   :  { %s116_s18 = scalar_lea.vmem %s27_s14, 16  ;;  %p121_p1 = scmp.lt.s32.totalorder %s27_s14, %s27_s14 }
   0x6   :  { %p117_p0 = scmp.ne.s32.totalorder %s27_s14, %s116_s18  ;;  %p122_p2 = scmp.lt.s32.totalorder %s116_s18, %s116_s18 }
   0x8   :  { %p123_p3 = por %p122_p2, %p121_p1 }
   0xa   :  { %p124_p4 = pnand %p123_p3, %p117_p0 }
   0xc   :  { %127 = shalt.err (!%p124_p4)
}
   0xd   :  { %s177_s19 = smov [#allocation7]   ;;  %s178_s20 = smov [#allocation8]  }
   0xe   :  { %29 = dma.vmem_to_smem %s27_s14, 16, %s177_s19, [#allocation6]  }
   0xf   :  { %s36_s21 = sshll.u32 %s178_s20, 4  ;;  %s37_s21 = int_to_ptr.vmem [resolvable:$true] %s36_s21 }
  0x10   :  { %s136_s22 = scalar_lea.vmem %s37_s21, 128  ;;  %p141_p6 = scmp.lt.s32.totalorder %s37_s21, %s37_s21 }
  0x11   :  { %p137_p5 = scmp.ne.s32.totalorder %s37_s21, %s136_s22  ;;  %p142_p7 = scmp.lt.s32.totalorder %s136_s22, %s136_s22 }
  0x13   :  { %p143_p8 = por %p142_p7, %p141_p6 }
  0x15   :  { %p144_p9 = pnand %p143_p8, %p137_p5 }
  0x17   :  { %147 = shalt.err (!%p144_p9)
}
  0x18   :  { %39 = dma.hbm_to_vmem [thread:$0]  %s216_s2, 128, %s37_s21, [#allocation3]  }
  0x19   :  { %168 = dma.done.wait [#allocation5], 16  }
  0x1a   :  { %169 = vsyncadd [#allocation5], 4294967280 }
  0x1b   :  { %170 = dma.done.wait [#allocation6], 16  }
  0x1c   :  { %171 = vsyncadd [#allocation6], 4294967280 }
  0x1d   :  { %172 = dma.done.wait [#allocation3], 128  }
  0x1e   :  { %173 = vsyncadd [#allocation3], 4294967168 }
  0x1f   :  { %49 = sfence }
  0x20   :  { %v50_v0 = vld [vmem:[#allocation8] sm:$0xff]  ;;  %s179_s23 = smov 127   ;;  %s180_s24 = smov 1   ;;  %v55_v1 = vlaneseq }
  0x21   :  { %51 = vrot.lane.b32.xlu0 %v50_v0, %s179_s23  ;;  %s59_s25 = sld [smem:[#allocation2]]  ;;  %s181_s30 = smov [#allocation9]  }
  0x22   :  { %s98_s26 = sld [smem:[#allocation2 + $0x1]]  ;;  %v56_v6 = vand.u32 127, %v55_v1  ;;  %s87_s4 = sshll.u32 %s181_s30, 4  ;;  %s88_s4 = int_to_ptr.vmem [resolvable:$true] %s87_s4 }
  0x23   :  { %s100_s27 = sld [smem:[#allocation2 + $0x3]]  ;;  %s148_s5 = scalar_lea.vmem %s88_s4, 128 }
  0x24   :  { %s99_s28 = sld [smem:[#allocation2 + $0x2]]  ;;  %v57_v12 = vand.u32 1, %v56_v6  ;;  %p149_p10 = scmp.ne.s32.totalorder %s88_s4, %s148_s5 }
  0x25   :  { %53 = vrot.lane.b32.xlu0 %v50_v0, %s180_s24  ;;  %s66_s29 = sld [smem:[#allocation7]]  ;;  %p153_p11 = scmp.lt.s32.totalorder %s88_s4, %s88_s4 }
  0x26   :  { %s101_s2 = sld [smem:[#allocation7 + $0x1]]  ;;  %vm58_vm0 = vcmp.eq.s32.totalorder %v57_v12, 0  ;;  %p154_p12 = scmp.lt.s32.totalorder %s148_s5, %s148_s5 }
  0x27   :  { %v60_v2 = vstv %s59_s25 }
  0x28   :  { %v63_v3 = vstv %s98_s26  ;;  %v61_v7 = vmul.f32 %v60_v2, %v50_v0  ;;  %p155_p13 = por %p154_p12, %p153_p11 }
  0x29   :  { %v73_v5 = vstv %s100_s27 }
  0x2a   :  { %v70_v9 = vstv %s99_s28  ;;  %v74_v10 = vmul.f32 %v73_v5, %v50_v0  ;;  %p156_p0 = pnand %p155_p13, %p149_p10 }
  0x2b   :  { %v67_v15 = vstv %s66_s29 }
  0x2c   :  { %v77_v16 = vstv %s101_s2 }
  0x93   :  { %v52_v4 = vpop.permute.xlu0 %51 }
  0x94   :  { %v64_v8 = vmul.f32 %v63_v3, %v52_v4 }
  0x96   :  { %v65_v13 = vadd.f32 %v64_v8, %v61_v7 }
  0x97   :  { %v54_v11 = vpop.permute.xlu0 %53 }
  0x98   :  { %v71_v14 = vmul.f32 %v70_v9, %v54_v11  ;;  %v68_v18 = vadd.f32 %v67_v15, %v65_v13 }
  0x9a   :  { %v75_v17 = vadd.f32 %v74_v10, %v71_v14 }
  0x9c   :  { %v78_v19 = vadd.f32 %v77_v16, %v75_v17 }
  0x9e   :  { %v79_v20 = vsel %vm58_vm0, %v68_v18, %v78_v19 }
  0x9f   :  { %80 = vst [vmem:[#allocation9] sm:$0xff] %v79_v20 }
  0xa0   :  { %159 = shalt.err (!%p156_p0)
}
  0xa1   :  { %90 = dma.vmem_to_hbm [thread:$0]  %s88_s4, 128, %s217_s3, [#allocation4]  }
  0xa2   :  { %174 = dma.done.wait [#allocation4], 128  }
  0xa3   :  { %175 = vsyncadd [#allocation4], 4294967168 }
  0xa4   :  { %94 = vsyncpa [#allocation3], 1 }
  0xa5   :  { %95 = vsyncpa [#allocation4], 1 }
  0xa6   :  { %96 = vsyncpa [#allocation5], 1 }
  0xa7   :  { %97 = vsyncpa [#allocation6], 1 }

</bundles_post_ra>
